<compile_context>
chip_gen: v7x
topology: tpu7x:2x2x1
jax: 0.10.0
libtpu: 0.0.40
codegen_flags: <defaults>
</compile_context>

<pallas_src>
import functools

import jax
import jax.numpy as jnp
from jax.experimental import pallas as pl
from jax.experimental.pallas import tpu as pltpu

# Problem sizes (reduction_ratio=16 requires C >= 16)
B, C, H, W = 2, 32, 16, 16
R = 16                 # reduction ratio
CR = C // R            # hidden width of the channel-gate MLP
KS = 7                 # spatial conv kernel size
PAD = (KS - 1) // 2
HW = H * W


def _cbam_kernel(x_ref, mlp_ref, wmat_ref, out_ref, *, chans, cr):
    """One batch element per grid step.

    x_ref:    (C, HW)        VMEM f32, lane-dense
    mlp_ref:  (C+1, 2*CR+1)  VMEM f32, packed [[w1^T | w2 | b2], [b1 | 0 | 0]]
    wmat_ref: (2*HW, HW)     VMEM bf16, fused Toeplitz conv weights [max ; mean]
    out_ref:  (C, HW)
    """
    x = x_ref[...].astype(jnp.float32)                     # (C, HW)

    # ---------------- ChannelGate (VPU/XLU only, MXU untouched) ----------------
    avg = jnp.mean(x, axis=1, keepdims=True)               # (C, 1)  lane reduce
    mx = jnp.max(x, axis=1, keepdims=True)                 # (C, 1)

    mlp = mlp_ref[...]                                     # (C+1, 2CR+1)
    w1t = mlp[:chans, :cr]                                 # (C, CR)
    b1r = mlp[chans:chans + 1, :cr]                        # (1, CR)
    w2n = mlp[:chans, cr:2 * cr]                           # (C, CR)
    b2c = mlp[:chans, 2 * cr:2 * cr + 1]                   # (C, 1)

    # hidden = relu(pool @ w1^T + b1) per pooling branch; CR=2 so these are
    # rank-CR broadcast-multiplies + reduces on otherwise-idle VPU/XLU slots.
    h_avg = jnp.sum(avg * w1t, axis=0, keepdims=True) + b1r    # (1, CR)
    h_max = jnp.sum(mx * w1t, axis=0, keepdims=True) + b1r     # (1, CR)
    h = jnp.maximum(h_avg, 0.0) + jnp.maximum(h_max, 0.0)      # avg+max branches
    # att[c] = sum_j h[j] * w2[c, j] + 2*b2[c]  (b2 contributes once per branch)
    att = jnp.sum(h * w2n, axis=1, keepdims=True) + 2.0 * b2c  # (C, 1)
    scale_c = jax.nn.sigmoid(att)                              # (C, 1)
    x_cg = x * scale_c                                         # (C, HW)
    # NOTE: at this size x and x_cg together are only ~16 vregs; for much larger
    # C*HW, stream the channel pools over c instead to halve peak vreg pressure.

    # ---------------- SpatialGate ----------------
    cmax = jnp.max(x_cg, axis=0, keepdims=True)             # (1, HW) sublane reduce
    cmean = jnp.mean(x_cg, axis=0, keepdims=True)           # (1, HW)
    pooled = jnp.concatenate([cmax, cmean], axis=1).astype(jnp.bfloat16)  # (1, 2HW)
    # Single bf16 MXU matmul (f32 accumulation) == Conv2d(2,1,7,7,pad=3,no bias).
    conv = jnp.dot(pooled, wmat_ref[...],
                   preferred_element_type=jnp.float32)       # (1, HW)
    scale_s = jax.nn.sigmoid(conv)                           # (1, HW)

    out_ref[...] = (x_cg * scale_s).astype(out_ref.dtype)


def conv7x7_to_matmul_weights(wconv, h, w, pad):
    """Lower a (2-in, 1-out) KSxKS 'same' conv to two (h*w, h*w) matmul weights.

    Wmat[c, h'*w + w', ho*w + wo] = wconv[c, h'-ho+pad, w'-wo+pad] (0 where out of
    the kernel support), so that  out = max_pool_flat @ Wmat[0] + mean_pool_flat @ Wmat[1]
    reproduces Conv2d(2, 1, KS, padding=pad, bias=False) exactly.
    Weight-only preprocessing; done once at init, never on the forward path.
    """
    ks = wconv.shape[-1]
    dh = jnp.arange(h)[:, None] - jnp.arange(h)[None, :] + pad    # (h_in, h_out)
    dw = jnp.arange(w)[:, None] - jnp.arange(w)[None, :] + pad    # (w_in, w_out)
    vh = (dh >= 0) & (dh < ks)
    vw = (dw >= 0) & (dw < ks)
    taps = wconv[:, jnp.clip(dh, 0, ks - 1)[:, None, :, None],
                 jnp.clip(dw, 0, ks - 1)[None, :, None, :]]       # (2, h, w, h, w)
    mask = (vh[:, None, :, None] & vw[None, :, None, :])[None]
    taps = jnp.where(mask, taps, 0.0)
    return taps.reshape(wconv.shape[0], h * w, h * w)


def cbam_prepare_params(w1, b1, w2, b2, wconv, h, w):
    """One-time weight preprocessing (hoisted off the forward path).

    Returns:
      mlp_pack: (C+1, 2*CR+1) f32 -- [[w1^T | w2 | b2], [b1 | 0 | 0]]
      wmat:     (2*h*w, h*w)  bf16 -- fused Toeplitz matmul weights, row-blocks
                ordered [max-pool ; mean-pool] to match the kernel's cmax||cmean.

    Note: PyTorch's Conv2d(2, 1, 7, 7) weight is OIHW (1, 2, 7, 7); pass it here
    with the O dim squeezed, i.e. shape (2, 7, 7).
    """
    cr, cn = w1.shape
    mlp_pack = jnp.zeros((cn + 1, 2 * cr + 1), jnp.float32)
    mlp_pack = mlp_pack.at[:cn, :cr].set(w1.T)
    mlp_pack = mlp_pack.at[cn, :cr].set(b1)
    mlp_pack = mlp_pack.at[:cn, cr:2 * cr].set(w2)
    mlp_pack = mlp_pack.at[:cn, 2 * cr].set(b2)

    wmat = conv7x7_to_matmul_weights(wconv, h, w, PAD)            # (2, HW, HW) f32
    wmat = wmat.reshape(2 * h * w, h * w).astype(jnp.bfloat16)    # fused + bf16
    return mlp_pack, wmat


def cbam_forward(x, mlp_pack, wmat):
    bn, cn, hn, wn = x.shape
    hw = hn * wn
    cr = (mlp_pack.shape[1] - 1) // 2
    x3 = x.reshape(bn, cn, hw)                         # lane-dense layout (free reshape)

    kernel = functools.partial(_cbam_kernel, chans=cn, cr=cr)
    out3 = pl.pallas_call(
        kernel,
        out_shape=jax.ShapeDtypeStruct((bn, cn, hw), x.dtype),
        grid=(bn,),                                    # one batch element per step
        in_specs=[
            pl.BlockSpec((None, cn, hw), lambda b: (b, 0, 0)),
            # Constant block index across the grid -> weights are DMA'd exactly
            # once and stay VMEM-resident for all subsequent steps.
            pl.BlockSpec((cn + 1, 2 * cr + 1), lambda b: (0, 0)),
            pl.BlockSpec((2 * hw, hw), lambda b: (0, 0)),
        ],
        out_specs=pl.BlockSpec((None, cn, hw), lambda b: (b, 0, 0)),
        compiler_params=pltpu.CompilerParams(
            dimension_semantics=("parallel",)),        # v7x: split batch across TCs
    )(x3, mlp_pack, wmat)
    return out3.reshape(bn, cn, hn, wn)


def cbam_reference(x, w1, b1, w2, b2, wconv):
    """Pure-JAX reference reproducing the PyTorch forward (full f32 precision)."""
    bn, cn, hn, wn = x.shape
    xf = x.reshape(bn, cn, hn * wn)
    avg = xf.mean(axis=2)                                  # F.avg_pool2d over full HxW
    mx = xf.max(axis=2)                                    # F.max_pool2d over full HxW

    hp = jax.lax.Precision.HIGHEST

    def mlp(v):  # v: (B, C)
        h1 = jnp.maximum(jnp.dot(v, w1.T, precision=hp) + b1, 0.0)
        return jnp.dot(h1, w2.T, precision=hp) + b2

    att = mlp(avg) + mlp(mx)
    scale_c = jax.nn.sigmoid(att)[:, :, None, None]
    x_cg = x * scale_c

    cmax = x_cg.max(axis=1, keepdims=True)
    cmean = x_cg.mean(axis=1, keepdims=True)
    pool = jnp.concatenate([cmax, cmean], axis=1)          # (B, 2, H, W)
    conv = jax.lax.conv_general_dilated(
        pool, wconv[None], window_strides=(1, 1), padding=[(PAD, PAD), (PAD, PAD)],
        dimension_numbers=("NCHW", "OIHW", "NCHW"), precision=hp)
    scale_s = jax.nn.sigmoid(conv)                         # (B, 1, H, W)
    return x_cg * scale_s


if __name__ == "__main__":
    key = jax.random.PRNGKey(0)
    kx, k1, k2, k3, k4, k5 = jax.random.split(key, 6)

    x = jax.random.normal(kx, (B, C, H, W), dtype=jnp.float32)

    # Deterministic synthetic parameters (shapes follow the module's __init__)
    w1 = 0.1 * jax.random.normal(k1, (CR, C), dtype=jnp.float32)       # Linear(C, C//r)
    b1 = 0.1 * jax.random.normal(k2, (CR,), dtype=jnp.float32)
    w2 = 0.1 * jax.random.normal(k3, (C, CR), dtype=jnp.float32)       # Linear(C//r, C)
    b2 = 0.1 * jax.random.normal(k4, (C,), dtype=jnp.float32)
    wconv = 0.1 * jax.random.normal(k5, (2, KS, KS), dtype=jnp.float32)  # Conv2d(2,1,7), no bias

    # One-time weight preprocessing, kept off the per-call forward path.
    mlp_pack, wmat = cbam_prepare_params(w1, b1, w2, b2, wconv, H, W)
    mlp_pack = jax.block_until_ready(mlp_pack)
    wmat = jax.block_until_ready(wmat)

    fwd = jax.jit(cbam_forward)
    out = jax.block_until_ready(fwd(x, mlp_pack, wmat))

    ref = jax.block_until_ready(cbam_reference(x, w1, b1, w2, b2, wconv))
    assert out.shape == (B, C, H, W)
    err = float(jnp.max(jnp.abs(out - ref)))
    # The spatial-conv matmul uses bf16 operands with f32 accumulation; versus
    # the pure-f32 reference this bounds the max abs error at a few 1e-3.
    # Everything else (channel gate, sigmoids, final scaling) stays in f32.
    assert err < 1e-2, err
    print("KERNEL_OK")
</pallas_src>

<mosaic_0001>
module attributes {stable_mosaic.version = 11 : i64} {
  func.func @_cbam_kernel(%arg0: i32, %arg1: memref<1x32x256xf32, #tpu.memory_space<vmem>>, %arg2: memref<33x5xf32, #tpu.memory_space<vmem>>, %arg3: memref<512x256xbf16, #tpu.memory_space<vmem>>, %arg4: memref<1x32x256xf32, #tpu.memory_space<vmem>>) attributes {dimension_semantics = [#tpu.dimension_semantics<parallel>], iteration_bounds = array<i64: 2>, scalar_prefetch = 0 : i64, scratch_operands = 0 : i64, tpu.core_type = #tpu.core_type<tc>, window_params = [{transform_indices = @transform_0, window_bounds = array<i64: 1, 32, 256>}, {pipeline_mode = #tpu.pipeline_mode<synchronous>, transform_indices = @transform_1, window_bounds = array<i64: 33, 5>}, {pipeline_mode = #tpu.pipeline_mode<synchronous>, transform_indices = @transform_2, window_bounds = array<i64: 512, 256>}, {transform_indices = @transform_3, window_bounds = array<i64: 1, 32, 256>}]} {
    %c0 = arith.constant 0 : index
    %c0_0 = arith.constant 0 : index
    %c0_1 = arith.constant 0 : index
    %0 = vector.load %arg1[%c0, %c0_0, %c0_1] : memref<1x32x256xf32, #tpu.memory_space<vmem>>, vector<1x32x256xf32>
    %1 = vector.shape_cast %0 : vector<1x32x256xf32> to vector<32x256xf32>
    %cst = arith.constant dense<0.000000e+00> : vector<32xf32>
    %2 = vector.multi_reduction <add>, %1, %cst [1] : vector<32x256xf32> to vector<32xf32>
    %3 = vector.shape_cast %2 : vector<32xf32> to vector<32x1xf32>
    %cst_2 = arith.constant 2.560000e+02 : f32
    %4 = vector.broadcast %cst_2 : f32 to vector<32x1xf32>
    %5 = arith.divf %3, %4 : vector<32x1xf32>
    %cst_3 = arith.constant dense<0xFF800000> : vector<32xf32>
    %6 = vector.multi_reduction <maximumf>, %1, %cst_3 [1] : vector<32x256xf32> to vector<32xf32>
    %7 = vector.shape_cast %6 : vector<32xf32> to vector<32x1xf32>
    %c0_4 = arith.constant 0 : index
    %c0_5 = arith.constant 0 : index
    %8 = vector.load %arg2[%c0_4, %c0_5] : memref<33x5xf32, #tpu.memory_space<vmem>>, vector<33x5xf32>
    %9 = vector.extract_strided_slice %8 {offsets = [0, 0], sizes = [32, 2], strides = [1, 1]} : vector<33x5xf32> to vector<32x2xf32>
    %10 = vector.extract_strided_slice %8 {offsets = [32, 0], sizes = [1, 2], strides = [1, 1]} : vector<33x5xf32> to vector<1x2xf32>
    %11 = vector.extract_strided_slice %8 {offsets = [0, 2], sizes = [32, 2], strides = [1, 1]} : vector<33x5xf32> to vector<32x2xf32>
    %12 = vector.extract_strided_slice %8 {offsets = [0, 4], sizes = [32, 1], strides = [1, 1]} : vector<33x5xf32> to vector<32x1xf32>
    %13 = vector.broadcast %5 : vector<32x1xf32> to vector<32x2xf32>
    %14 = arith.mulf %13, %9 : vector<32x2xf32>
    %cst_6 = arith.constant dense<0.000000e+00> : vector<2xf32>
    %15 = vector.multi_reduction <add>, %14, %cst_6 [0] : vector<32x2xf32> to vector<2xf32>
    %16 = vector.shape_cast %15 : vector<2xf32> to vector<1x2xf32>
    %17 = arith.addf %16, %10 : vector<1x2xf32>
    %18 = vector.broadcast %7 : vector<32x1xf32> to vector<32x2xf32>
    %19 = arith.mulf %18, %9 : vector<32x2xf32>
    %cst_7 = arith.constant dense<0.000000e+00> : vector<2xf32>
    %20 = vector.multi_reduction <add>, %19, %cst_7 [0] : vector<32x2xf32> to vector<2xf32>
    %21 = vector.shape_cast %20 : vector<2xf32> to vector<1x2xf32>
    %22 = arith.addf %21, %10 : vector<1x2xf32>
    %cst_8 = arith.constant 0.000000e+00 : f32
    %23 = vector.broadcast %cst_8 : f32 to vector<1x2xf32>
    %24 = arith.maximumf %17, %23 : vector<1x2xf32>
    %cst_9 = arith.constant 0.000000e+00 : f32
    %25 = vector.broadcast %cst_9 : f32 to vector<1x2xf32>
    %26 = arith.maximumf %22, %25 : vector<1x2xf32>
    %27 = arith.addf %24, %26 : vector<1x2xf32>
    %28 = vector.broadcast %27 : vector<1x2xf32> to vector<32x2xf32>
    %29 = arith.mulf %28, %11 : vector<32x2xf32>
    %cst_10 = arith.constant dense<0.000000e+00> : vector<32xf32>
    %30 = vector.multi_reduction <add>, %29, %cst_10 [1] : vector<32x2xf32> to vector<32xf32>
    %31 = vector.shape_cast %30 : vector<32xf32> to vector<32x1xf32>
    %cst_11 = arith.constant 2.000000e+00 : f32
    %32 = vector.broadcast %cst_11 : f32 to vector<32x1xf32>
    %33 = arith.mulf %32, %12 : vector<32x1xf32>
    %34 = arith.addf %31, %33 : vector<32x1xf32>
    %35 = arith.negf %34 : vector<32x1xf32>
    %36 = math.exp %35 : vector<32x1xf32>
    %cst_12 = arith.constant 1.000000e+00 : f32
    %37 = vector.broadcast %cst_12 : f32 to vector<32x1xf32>
    %38 = arith.addf %37, %36 : vector<32x1xf32>
    %39 = arith.divf %37, %38 : vector<32x1xf32>
    %40 = vector.broadcast %39 : vector<32x1xf32> to vector<32x256xf32>
    %41 = arith.mulf %1, %40 : vector<32x256xf32>
    %cst_13 = arith.constant dense<0xFF800000> : vector<256xf32>
    %42 = vector.multi_reduction <maximumf>, %41, %cst_13 [0] : vector<32x256xf32> to vector<256xf32>
    %43 = vector.shape_cast %42 : vector<256xf32> to vector<1x256xf32>
    %cst_14 = arith.constant dense<0.000000e+00> : vector<256xf32>
    %44 = vector.multi_reduction <add>, %41, %cst_14 [0] : vector<32x256xf32> to vector<256xf32>
    %45 = vector.shape_cast %44 : vector<256xf32> to vector<1x256xf32>
    %cst_15 = arith.constant 3.200000e+01 : f32
    %46 = vector.broadcast %cst_15 : f32 to vector<1x256xf32>
    %47 = arith.divf %45, %46 : vector<1x256xf32>
    %48 = tpu.concatenate %43, %47 in 1 : vector<1x256xf32>, vector<1x256xf32> -> vector<1x512xf32>
    %49 = arith.truncf %48 : vector<1x512xf32> to vector<1x512xbf16>
    %c0_16 = arith.constant 0 : index
    %c0_17 = arith.constant 0 : index
    %50 = vector.load %arg3[%c0_16, %c0_17] : memref<512x256xbf16, #tpu.memory_space<vmem>>, vector<512x256xbf16>
    %cst_18 = arith.constant dense<0.000000e+00> : vector<1x256xf32>
    %51 = tpu.matmul %49, %50, %cst_18 {dimension_numbers = #tpu.dot_dimension_numbers<[1], [0], [0], [1], [0, 0, 1, 1], [], []>} : vector<1x512xbf16>, vector<512x256xbf16>, vector<1x256xf32> -> vector<1x256xf32>
    %52 = arith.negf %51 : vector<1x256xf32>
    %53 = math.exp %52 : vector<1x256xf32>
    %cst_19 = arith.constant 1.000000e+00 : f32
    %54 = vector.broadcast %cst_19 : f32 to vector<1x256xf32>
    %55 = arith.addf %54, %53 : vector<1x256xf32>
    %56 = arith.divf %54, %55 : vector<1x256xf32>
    %57 = vector.broadcast %56 : vector<1x256xf32> to vector<32x256xf32>
    %58 = arith.mulf %41, %57 : vector<32x256xf32>
    %c0_20 = arith.constant 0 : index
    %c0_21 = arith.constant 0 : index
    %c0_22 = arith.constant 0 : index
    %59 = vector.load %arg4[%c0_20, %c0_21, %c0_22] : memref<1x32x256xf32, #tpu.memory_space<vmem>>, vector<1x32x256xf32>
    %60 = vector.shape_cast %59 : vector<1x32x256xf32> to vector<32x256xf32>
    %61 = vector.shape_cast %58 : vector<32x256xf32> to vector<1x32x256xf32>
    tpu.vector_store %arg4[%c0_20, %c0_21, %c0_22], %61 {strides = array<i32>} : memref<1x32x256xf32, #tpu.memory_space<vmem>>, vector<1x32x256xf32>,
    return
  }
  func.func @transform_0(%arg0: i32) -> (i32, i32, i32) {
    %c0_i32 = arith.constant 0 : i32
    %c0_i32_0 = arith.constant 0 : i32
    %c0_i32_1 = arith.constant 0 : i32
    return %arg0, %c0_i32, %c0_i32_0 : i32, i32, i32
  }
  func.func @transform_1(%arg0: i32) -> (i32, i32) {
    %c0_i32 = arith.constant 0 : i32
    %c0_i32_0 = arith.constant 0 : i32
    %c0_i32_1 = arith.constant 0 : i32
    return %c0_i32, %c0_i32_0 : i32, i32
  }
  func.func @transform_2(%arg0: i32) -> (i32, i32) {
    %c0_i32 = arith.constant 0 : i32
    %c0_i32_0 = arith.constant 0 : i32
    %c0_i32_1 = arith.constant 0 : i32
    return %c0_i32, %c0_i32_0 : i32, i32
  }
  func.func @transform_3(%arg0: i32) -> (i32, i32, i32) {
    %c0_i32 = arith.constant 0 : i32
    %c0_i32_0 = arith.constant 0 : i32
    %c0_i32_1 = arith.constant 0 : i32
    return %arg0, %c0_i32, %c0_i32_0 : i32, i32, i32
  }
}

</mosaic_0001>

<bundles_post_ra>
// kernel: cbam_forward.1
= control target key start
LH: loop header
LB: loop body
LE: loop exit
PB: predicated region body
PF: predicated region fallthrough
CT: control target
= control target key end

     0   :  { %s1196_s12 = smov 0   ;;  %s1548_s0 = inlined_call_operand.vmem [shape: f32[2,32,256], index: 0, kind: input, shape index: {}]   ;;  %s1549_s1 = inlined_call_operand.vmem [shape: f32[33,5], index: 1, kind: input, shape index: {}]   ;;  %s1550_s2 = inlined_call_operand.vmem [shape: bf16[512,256], index: 2, kind: input, shape index: {}]   ;;  %s1551_s3 = inlined_call_operand.vmem [shape: f32[2,32,256], index: 3, kind: output, shape index: {}]  }
   0x1 LB: > { %s949_s13 = sadd.s32 4294967295, %s1172_s12   ;;  %p953_p0 = scmp.ge.s32.totalorder %s1172_s12, 1  ;;  %s1172_s12 = sphi %s1196_s12, %s13_s12  }
   0x2   : > { %p137_p1 = scmp.lt.s32.totalorder %s1172_s12, 3 }
   0x4   : > { %p138_p2 = pnand %p953_p0, %p137_p1 }
   0x5   : > { %p161_p3 = scmp.lt.s32.totalorder (!%p138_p2), %s949_s13, 1  ;;  %v1247_v16 = vld [vmem:[%s1549_s1 + $0x8] sm:$0xff] (!%p138_p2)  ;;  %s1174_s20 = smov (!%p138_p2), 126   ;;  %v1253_v17 = vld [vmem:[%s1549_s1 + $0x10] sm:$0xff] (!%p138_p2)  ;;  %v1258_v18 = vld [vmem:[%s1549_s1] sm:$0xff] (!%p138_p2)  ;;  %vm217_vm0 = vcmask (!%p138_p2), 15360  }
   0x6   : > { %141 = sbr.rel (%p138_p2) target bundleno = 779 (0x30b), region = 32  ;;  %v1264_v19 = vld [vmem:[%s1549_s1 + $0x18] sm:$0xff] (!%p138_p2) }
   0xd   : > { %s1553_s13 = smov (!%p161_p3, %s949_s13), 1 }
   0xe   : > { %s1030_s14 = sshll.u32 %s1553_s13, 6 }
   0xf   : > { %s165_s17 = scalar_lea.vmem %s1548_s0, %s1030_s14  ;;  %s170_s15 = scalar_lea.vmem %s1551_s3, %s1030_s14 }
  0x10   : > { %v1212_v0 = vld [vmem:[%s165_s17 + $0x20] sm:$0xff]  ;;  %v1214_v1 = vld [vmem:[%s165_s17 + $0x28] sm:$0xff]  ;;  %v1222_v5 = vld [vmem:[%s165_s17 + $0x10] sm:$0xff] }
  0x11   : > { %v1216_v2 = vld [vmem:[%s165_s17] sm:$0xff]  ;;  %v185_v3 = vadd.f32 %v1214_v1, %v1212_v0  ;;  %v1220_v4 = vld [vmem:[%s165_s17 + $0x8] sm:$0xff]  ;;  %v1224_v6 = vld [vmem:[%s165_s17 + $0x18] sm:$0xff]  ;;  %v202_v15 = vmax.f32 %v1212_v0, %v1214_v1 }
  0x12   : > { %v179_v7 = vadd.f32 %v1220_v4, %v1216_v2  ;;  %v1228_v8 = vld [vmem:[%s165_s17 + $0x30] sm:$0xff]  ;;  %v1230_v9 = vld [vmem:[%s165_s17 + $0x38] sm:$0xff]  ;;  %v196_v10 = vmax.f32 %v1216_v2, %v1220_v4  ;;  %v182_v11 = vadd.f32 %v1224_v6, %v1222_v5  ;;  %v199_v13 = vmax.f32 %v1222_v5, %v1224_v6 }
  0x13   : > { %186 = vadd.xlane.f32.xlu1 %v185_v3  ;;  %v188_v12 = vadd.f32 %v1230_v9, %v1228_v8  ;;  %v205_v14 = vmax.f32 %v1228_v8, %v1230_v9  ;;  %v253_v3 = vlaneseq }
  0x14   : > { %180 = vadd.xlane.f32.xlu0 %v179_v7  ;;  %v212_v7 = vld [vmem:[%s1549_s1 + $0x20] sm:$0x1] }
  0x17   : > { %197 = vmax.xlane.f32.xlu1 %v196_v10 }
  0x18   : > { %183 = vadd.xlane.f32.xlu0 %v182_v11 }
  0x1b   : > { %189 = vadd.xlane.f32.xlu1 %v188_v12  ;;  %v254_v12 = vshrl.u32 %v253_v3, 7  ;;  %v1087_v3 = vld [vmem:[%s1550_s2 + $0x160] ss:$8 sps:$4 sm:$0xff]  }
  0x1c   : > { %200 = vmax.xlane.f32.xlu0 %v199_v13 }
  0x1f   : > { %206 = vmax.xlane.f32.xlu1 %v205_v14 }
  0x20   : > { %203 = vmax.xlane.f32.xlu0 %v202_v15 }
  0x30   : > { %263 = vrot.lane.b32.xlu1 %v1247_v16, %s1174_s20 }
  0x34   : > { %265 = vrot.lane.b32.xlu1 %v1253_v17, %s1174_s20 }
  0x36   : > { %261 = vrot.lane.b32.xlu0 %v1258_v18, %s1174_s20 }
  0x38   : > { %267 = vrot.lane.b32.xlu1 %v1264_v19, %s1174_s20 }
  0xa0   : > { %v187_v20 = vpop.xlane.xlu1 %186 }
  0xa1   : > { %v181_v21 = vpop.xlane.xlu0 %180  ;;  %v194_v23 = vmul.f32 0.00390625, %v187_v20 }
  0xa2   : > { %v192_v22 = vmul.f32 0.00390625, %v181_v21  ;;  %v1287_v21 = vsub.s32 0, %v254_v12  ;;  %v1093_v12 = vld [vmem:[%s1550_s2 + $0x170] ss:$8 sps:$4 sm:$0xff]  }
  0xa3   : > { %v215_v28 = vmul.f32 %v1253_v17, %v194_v23 }
  0xa4   : > { %v198_v24 = vpop.xlane.xlu1 %197  ;;  %v213_v26 = vmul.f32 %v1258_v18, %v192_v22 }
  0xa5   : > { %v184_v25 = vpop.xlane.xlu0 %183  ;;  %v232_v34 = vmul.f32 %v1258_v18, %v198_v24  ;;  %v221_v39 = vsel %vm217_vm0, %v215_v28, 0.0 }
  0xa6   : > { %v193_v27 = vmul.f32 0.00390625, %v184_v25  ;;  %v218_v33 = vsel %vm217_vm0, %v213_v26, 0.0 }
  0xa7   : > { %v236_v46 = vsel %vm217_vm0, %v232_v34, 0.0 }
  0xa8   : > { %v214_v29 = vmul.f32 %v1247_v16, %v193_v27  ;;  %v190_v30 = vpop.xlane.xlu1 %189 }
  0xa9   : > { %v195_v31 = vmul.f32 0.00390625, %v190_v30  ;;  %v201_v32 = vpop.xlane.xlu0 %200 }
  0xaa   : > { %v219_v35 = vsel %vm217_vm0, %v214_v29, 0.0  ;;  %v233_v36 = vmul.f32 %v1247_v16, %v201_v32 }
  0xab   : > { %v220_v37 = vadd.f32 %v219_v35, %v218_v33  ;;  %v216_v38 = vmul.f32 %v1264_v19, %v195_v31 }
  0xac   : > { %v237_v40 = vsel %vm217_vm0, %v233_v36, 0.0  ;;  %v207_v41 = vpop.xlane.xlu1 %206  ;;  %v1175_v36 = vmov 4  }
  0xad   : > { %v222_v42 = vadd.f32 %v221_v39, %v220_v37  ;;  %v223_v43 = vsel %vm217_vm0, %v216_v38, 0.0  ;;  %v204_v44 = vpop.xlane.xlu0 %203  ;;  %v235_v45 = vmul.f32 %v1264_v19, %v207_v41  ;;  %v238_v49 = vadd.f32 %v237_v40, %v236_v46  ;;  %1045 = vset.pattern.permute.xlu1 %v1175_v36  ;;  %1044 = vset.pattern.permute.xlu0 %v1175_v36  ;;  %v1046_v37 = vld [vmem:[%s1550_s2 + $0x4] ss:$8 sps:$4 sm:$0xff]   ;;  %v1050_v39 = vld [vmem:[%s1550_s2] ss:$8 sps:$4 sm:$0xff]  }
  0xae   : > { %v234_v47 = vmul.f32 %v1253_v17, %v204_v44  ;;  %v1048_v38 = vld [vmem:[%s1550_s2 + $0x104] ss:$8 sps:$4 sm:$0xff]   ;;  %v1051_v40 = vld [vmem:[%s1550_s2 + $0x100] ss:$8 sps:$4 sm:$0xff]   ;;  %v1052_v41 = vld [vmem:[%s1550_s2 + $0x14] ss:$8 sps:$4 sm:$0xff]   ;;  %776 = vmatprep.subr.bf16.mxu1 %v1046_v37 }
  0xaf   : > { %v224_v48 = vadd.f32 %v223_v43, %v222_v42  ;;  %v241_v51 = vsel %vm217_vm0, %v235_v45, 0.0  ;;  %v1054_v42 = vld [vmem:[%s1550_s2 + $0x114] ss:$8 sps:$4 sm:$0xff]   ;;  %817 = vmatprep.subr.bf16.mxu0 %v1048_v38  ;;  %777 = vmatpush1.bf16.msra.mxu1 %v1050_v39  ;;  %v1056_v43 = vld [vmem:[%s1550_s2 + $0x10] ss:$8 sps:$4 sm:$0xff]  }
  0xb0   : > { %v239_v50 = vsel %vm217_vm0, %v234_v47, 0.0  ;;  %v264_v14 = vpop.permute.xlu1 %263  ;;  %818 = vmatpush1.bf16.msra.mxu0 %v1051_v40  ;;  %v1057_v44 = vld [vmem:[%s1550_s2 + $0x110] ss:$8 sps:$4 sm:$0xff]   ;;  %778 = vmatprep.subr.bf16.mxu1 %v1052_v41  ;;  %v1058_v45 = vld [vmem:[%s1550_s2 + $0x24] ss:$8 sps:$4 sm:$0xff]  }
  0xb1   : > { %v225_v52 = vrot.slane %v224_v48, 4  ;;  %v240_v53 = vadd.f32 %v239_v50, %v238_v49  ;;  %v262_v25 = vpop.permute.xlu0 %261  ;;  %819 = vmatprep.subr.bf16.mxu0 %v1054_v42  ;;  %v1060_v46 = vld [vmem:[%s1550_s2 + $0x124] ss:$8 sps:$4 sm:$0xff]   ;;  %v1062_v47 = vld [vmem:[%s1550_s2 + $0x20] ss:$8 sps:$4 sm:$0xff]  }
  0xb2   : > { %v1064_v49 = vld [vmem:[%s1550_s2 + $0x34] ss:$8 sps:$4 sm:$0xff]  }
  0xb3   : > { %v226_v54 = vadd.f32 %v225_v52, %v224_v48  ;;  %v242_v55 = vadd.f32 %v241_v51, %v240_v53  ;;  %779 = vmatpush1.bf16.msra.mxu1 %v1056_v43  ;;  %v1063_v48 = vld [vmem:[%s1550_s2 + $0x120] ss:$8 sps:$4 sm:$0xff]   ;;  %v1066_v50 = vld [vmem:[%s1550_s2 + $0x134] ss:$8 sps:$4 sm:$0xff]   ;;  %v1068_v51 = vld [vmem:[%s1550_s2 + $0x30] ss:$8 sps:$4 sm:$0xff]  }
  0xb4   : > { %v266_v24 = vpop.permute.xlu1 %265  ;;  %820 = vmatpush1.bf16.msra.mxu0 %v1057_v44  ;;  %780 = vmatprep.subr.bf16.mxu1 %v1058_v45  ;;  %v1069_v52 = vld [vmem:[%s1550_s2 + $0x130] ss:$8 sps:$4 sm:$0xff]   ;;  %v1070_v53 = vld [vmem:[%s1550_s2 + $0x44] ss:$8 sps:$4 sm:$0xff]   ;;  %v1100_v44 = vld [vmem:[%s1550_s2 + $0x94] ss:$8 sps:$4 sm:$0xff]  }
  0xb5   : > { %v227_v56 = vrot.slane %v226_v54, 2  ;;  %v243_v57 = vrot.slane %v242_v55, 4  ;;  %821 = vmatprep.subr.bf16.mxu0 %v1060_v46  ;;  %v1102_v45 = vld [vmem:[%s1550_s2 + $0x194] ss:$8 sps:$4 sm:$0xff]   ;;  %v1104_v46 = vld [vmem:[%s1550_s2 + $0x90] ss:$8 sps:$4 sm:$0xff]  }
  0xb7   : > { %v228_v58 = vadd.f32 %v227_v56, %v226_v54  ;;  %v244_v59 = vadd.f32 %v243_v57, %v242_v55  ;;  %781 = vmatpush1.bf16.msra.mxu1 %v1062_v47  ;;  %v1072_v54 = vld [vmem:[%s1550_s2 + $0x144] ss:$8 sps:$4 sm:$0xff]   ;;  %v1074_v55 = vld [vmem:[%s1550_s2 + $0x40] ss:$8 sps:$4 sm:$0xff]   ;;  %v1076_v57 = vld [vmem:[%s1550_s2 + $0x54] ss:$8 sps:$4 sm:$0xff]  }
  0xb8   : > { %v268_v32 = vpop.permute.xlu1 %267  ;;  %822 = vmatpush1.bf16.msra.mxu0 %v1063_v48  ;;  %782 = vmatprep.subr.bf16.mxu1 %v1064_v49  ;;  %v1075_v56 = vld [vmem:[%s1550_s2 + $0x140] ss:$8 sps:$4 sm:$0xff]   ;;  %v1105_v47 = vld [vmem:[%s1550_s2 + $0x190] ss:$8 sps:$4 sm:$0xff]   ;;  %v1106_v49 = vld [vmem:[%s1550_s2 + $0xa4] ss:$8 sps:$4 sm:$0xff]  }
  0xb9   : > { %v229_v60 = vrot.slane %v228_v58, 1  ;;  %v245_v61 = vrot.slane %v244_v59, 2  ;;  %823 = vmatprep.subr.bf16.mxu0 %v1066_v50  ;;  %v1108_v50 = vld [vmem:[%s1550_s2 + $0x1a4] ss:$8 sps:$4 sm:$0xff]  }
  0xbb   : > { %v230_v62 = vadd.f32 %v229_v60, %v228_v58  ;;  %v246_v63 = vadd.f32 %v245_v61, %v244_v59  ;;  %783 = vmatpush1.bf16.msra.mxu1 %v1068_v51  ;;  %v1078_v58 = vld [vmem:[%s1550_s2 + $0x154] ss:$8 sps:$4 sm:$0xff]   ;;  %v1080_v59 = vld [vmem:[%s1550_s2 + $0x50] ss:$8 sps:$4 sm:$0xff]   ;;  %v1082_v61 = vld [vmem:[%s1550_s2 + $0x64] ss:$8 sps:$4 sm:$0xff]  }
  0xbc   : > { %824 = vmatpush1.bf16.msra.mxu0 %v1069_v52  ;;  %784 = vmatprep.subr.bf16.mxu1 %v1070_v53  ;;  %v1081_v60 = vld [vmem:[%s1550_s2 + $0x150] ss:$8 sps:$4 sm:$0xff]   ;;  %v1110_v51 = vld [vmem:[%s1550_s2 + $0xa0] ss:$8 sps:$4 sm:$0xff]  }
  0xbd   : > { %v247_v10 = vrot.slane %v246_v63, 1  ;;  %v231_v13 = vadd.f32 %v230_v62, %v212_v7  ;;  %825 = vmatprep.subr.bf16.mxu0 %v1072_v54  ;;  %v1084_v62 = vld [vmem:[%s1550_s2 + $0x164] ss:$8 sps:$4 sm:$0xff]   ;;  %v1111_v52 = vld [vmem:[%s1550_s2 + $0x1a0] ss:$8 sps:$4 sm:$0xff]  }
  0xbe   : > { %v1112_v54 = vld [vmem:[%s1550_s2 + $0xb4] ss:$8 sps:$4 sm:$0xff]  }
  0xbf   : > { %v248_v11 = vadd.f32 %v247_v10, %v246_v63  ;;  %v250_v22 = vmax.f32 %v231_v13, 0.0  ;;  %785 = vmatpush1.bf16.msra.mxu1 %v1074_v55  ;;  %v1086_v63 = vld [vmem:[%s1550_s2 + $0x60] ss:$8 sps:$4 sm:$0xff]   ;;  %v1090_v10 = vld [vmem:[%s1550_s2 + $0x174] ss:$8 sps:$4 sm:$0xff]  }
  0xc0   : > { %826 = vmatpush1.bf16.msra.mxu0 %v1075_v56  ;;  %786 = vmatprep.subr.bf16.mxu1 %v1076_v57  ;;  %v1094_v13 = vld [vmem:[%s1550_s2 + $0x84] ss:$8 sps:$4 sm:$0xff]   ;;  %v1114_v55 = vld [vmem:[%s1550_s2 + $0x1b4] ss:$8 sps:$4 sm:$0xff]   ;;  %v1116_v56 = vld [vmem:[%s1550_s2 + $0xb0] ss:$8 sps:$4 sm:$0xff]  }
  0xc1   : > { %v249_v15 = vadd.f32 %v248_v11, %v212_v7  ;;  %827 = vmatprep.subr.bf16.mxu0 %v1078_v58  ;;  %v1088_v7 = vld [vmem:[%s1550_s2 + $0x74] ss:$8 sps:$4 sm:$0xff]   ;;  %v1092_v11 = vld [vmem:[%s1550_s2 + $0x70] ss:$8 sps:$4 sm:$0xff]   ;;  %v1118_v58 = vld [vmem:[%s1550_s2 + $0xc4] ss:$8 sps:$4 sm:$0xff]  }
  0xc2   : > { %v1117_v57 = vld [vmem:[%s1550_s2 + $0x1b0] ss:$8 sps:$4 sm:$0xff]  }
  0xc3   : > { %v251_v20 = vmax.f32 %v249_v15, 0.0  ;;  %787 = vmatpush1.bf16.msra.mxu1 %v1080_v59  ;;  %v1098_v15 = vld [vmem:[%s1550_s2 + $0x80] ss:$8 sps:$4 sm:$0xff]   ;;  %v1120_v59 = vld [vmem:[%s1550_s2 + $0x1c4] ss:$8 sps:$4 sm:$0xff]  }
  0xc4   : > { %828 = vmatpush1.bf16.msra.mxu0 %v1081_v60  ;;  %788 = vmatprep.subr.bf16.mxu1 %v1082_v61  ;;  %v1122_v60 = vld [vmem:[%s1550_s2 + $0xc0] ss:$8 sps:$4 sm:$0xff]  }
  0xc5   : > { %v252_v23 = vadd.f32 %v251_v20, %v250_v22  ;;  %829 = vmatprep.subr.bf16.mxu0 %v1084_v62  ;;  %v1099_v20 = vld [vmem:[%s1550_s2 + $0x180] ss:$8 sps:$4 sm:$0xff]   ;;  %v290_v22 = vmul.f32 2.0, %v1247_v16  ;;  %v1124_v62 = vld [vmem:[%s1550_s2 + $0xd4] ss:$8 sps:$4 sm:$0xff]  }
  0xc6   : > { %v1123_v61 = vld [vmem:[%s1550_s2 + $0x1c0] ss:$8 sps:$4 sm:$0xff]  }
  0xc7   : > { %v256_v26 = vrot.slane %v252_v23, %v1287_v21  ;;  %789 = vmatpush1.bf16.msra.mxu1 %v1086_v63  ;;  %v289_v23 = vmul.f32 2.0, %v1258_v18  ;;  %v1126_v63 = vld [vmem:[%s1550_s2 + $0x1d4] ss:$8 sps:$4 sm:$0xff]  }
  0xc8   : > { %830 = vmatpush1.bf16.msra.mxu0 %v1087_v3  ;;  %790 = vmatprep.subr.bf16.mxu1 %v1088_v7  ;;  %v1128_v3 = vld [vmem:[%s1550_s2 + $0xd0] ss:$8 sps:$4 sm:$0xff]  }
  0xc9   : > { %v274_v27 = vmul.f32 %v264_v14, %v256_v26  ;;  %v273_v28 = vmul.f32 %v262_v25, %v256_v26  ;;  %v275_v29 = vmul.f32 %v266_v24, %v256_v26  ;;  %v276_v33 = vmul.f32 %v268_v32, %v256_v26  ;;  %831 = vmatprep.subr.bf16.mxu0 %v1090_v10  ;;  %v1096_v14 = vld [vmem:[%s1550_s2 + $0x184] ss:$8 sps:$4 sm:$0xff]   ;;  %v1129_v7 = vld [vmem:[%s1550_s2 + $0x1d0] ss:$8 sps:$4 sm:$0xff]  }
  0xca   : > { %v1130_v10 = vld [vmem:[%s1550_s2 + $0xe4] ss:$8 sps:$4 sm:$0xff]  }
  0xcb   : > { %v280_v30 = vsel %vm217_vm0, %v274_v27, 0.0  ;;  %v277_v31 = vsel %vm217_vm0, %v273_v28, 0.0  ;;  %v283_v34 = vsel %vm217_vm0, %v275_v29, 0.0  ;;  %v286_v35 = vsel %vm217_vm0, %v276_v33, 0.0  ;;  %791 = vmatpush1.bf16.msra.mxu1 %v1092_v11  ;;  %v1132_v11 = vld [vmem:[%s1550_s2 + $0x1e4] ss:$8 sps:$4 sm:$0xff]  }
  0xcc   : > { %281 = vadd.xlane.f32.xlu1 %v280_v30  ;;  %278 = vadd.xlane.f32.xlu0 %v277_v31  ;;  %v291_v28 = vmul.f32 2.0, %v1253_v17  ;;  %v292_v33 = vmul.f32 2.0, %v1264_v19 }
  0xcd   : > { %832 = vmatpush1.bf16.msra.mxu0 %v1093_v12  ;;  %792 = vmatprep.subr.bf16.mxu1 %v1094_v13  ;;  %v1134_v12 = vld [vmem:[%s1550_s2 + $0xe0] ss:$8 sps:$4 sm:$0xff]  }
  0xce   : > { %833 = vmatprep.subr.bf16.mxu0 %v1096_v14  ;;  %v1135_v13 = vld [vmem:[%s1550_s2 + $0x1e0] ss:$8 sps:$4 sm:$0xff]   ;;  %v1136_v14 = vld [vmem:[%s1550_s2 + $0xf4] ss:$8 sps:$4 sm:$0xff]  }
  0xcf   : > { %793 = vmatpush1.bf16.msra.mxu1 %v1098_v15  ;;  %v1138_v15 = vld [vmem:[%s1550_s2 + $0x1f4] ss:$8 sps:$4 sm:$0xff]  }
  0xd0   : > { %284 = vadd.xlane.f32.xlu0 %v283_v34  ;;  %794 = vmatprep.subr.bf16.mxu1 %v1100_v44 }
  0xd1   : > { %834 = vmatpush1.bf16.msra.mxu0 %v1099_v20  ;;  %v1140_v20 = vld [vmem:[%s1550_s2 + $0xf0] ss:$8 sps:$4 sm:$0xff]  }
  0xd2   : > { %835 = vmatprep.subr.bf16.mxu0 %v1102_v45 }
  0xd3   : > { %795 = vmatpush1.bf16.msra.mxu1 %v1104_v46 }
  0xd4   : > { %287 = vadd.xlane.f32.xlu0 %v286_v35  ;;  %796 = vmatprep.subr.bf16.mxu1 %v1106_v49 }
  0xd5   : > { %836 = vmatpush1.bf16.msra.mxu0 %v1105_v47 }
  0xd6   : > { %837 = vmatprep.subr.bf16.mxu0 %v1108_v50 }
  0xd7   : > { %797 = vmatpush1.bf16.msra.mxu1 %v1110_v51 }
  0xd8   : > { %798 = vmatprep.subr.bf16.mxu1 %v1112_v54 }
  0xd9   : > { %838 = vmatpush1.bf16.msra.mxu0 %v1111_v52 }
  0xda   : > { %839 = vmatprep.subr.bf16.mxu0 %v1114_v55 }
  0xdb   : > { %799 = vmatpush1.bf16.msra.mxu1 %v1116_v56 }
  0xdc   : > { %800 = vmatprep.subr.bf16.mxu1 %v1118_v58 }
  0xdd   : > { %840 = vmatpush1.bf16.msra.mxu0 %v1117_v57 }
  0xde   : > { %841 = vmatprep.subr.bf16.mxu0 %v1120_v59 }
  0xdf   : > { %801 = vmatpush1.bf16.msra.mxu1 %v1122_v60 }
  0xe0   : > { %802 = vmatprep.subr.bf16.mxu1 %v1124_v62 }
  0xe1   : > { %842 = vmatpush1.bf16.msra.mxu0 %v1123_v61 }
  0xe2   : > { %843 = vmatprep.subr.bf16.mxu0 %v1126_v63 }
  0xe3   : > { %803 = vmatpush1.bf16.msra.mxu1 %v1128_v3 }
  0xe4   : > { %804 = vmatprep.subr.bf16.mxu1 %v1130_v10 }
  0xe5   : > { %844 = vmatpush1.bf16.msra.mxu0 %v1129_v7 }
  0xe6   : > { %845 = vmatprep.subr.bf16.mxu0 %v1132_v11 }
  0xe7   : > { %805 = vmatpush1.bf16.msra.mxu1 %v1134_v12 }
  0xe8   : > { %806 = vmatprep.subr.bf16.mxu1 %v1136_v14 }
  0xe9   : > { %846 = vmatpush1.bf16.msra.mxu0 %v1135_v13 }
  0xea   : > { %847 = vmatprep.subr.bf16.mxu0 %v1138_v15 }
  0xeb   : > { %807 = vmatpush1.bf16.msra.mxu1 %v1140_v20 }
 0x159   : > { %v282_v24 = vpop.xlane.xlu1 %281  ;;  %v279_v25 = vpop.xlane.xlu0 %278 }
 0x15a   : > { %v294_v26 = vadd.f32 %v290_v22, %v282_v24  ;;  %v293_v27 = vadd.f32 %v289_v23, %v279_v25  ;;  %v1141_v22 = vld [vmem:[%s1550_s2 + $0x1f0] ss:$8 sps:$4 sm:$0xff]  }
 0x15b   : > { %848 = vmatpush1.bf16.msra.mxu0 %v1141_v22 }
 0x15c   : > { %v959_v29 = vmul.f32 -1.442695, %v294_v26  ;;  %v958_v30 = vmul.f32 -1.442695, %v293_v27 }
 0x15d   : > { %v285_v31 = vpop.xlane.xlu0 %284 }
 0x15e   : > { %1142 = vpow2.f32 %v959_v29  ;;  %v295_v32 = vadd.f32 %v291_v28, %v285_v31 }
 0x15f   : > { %1144 = vpow2.f32 %v958_v30 }
 0x160   : > { %v960_v34 = vmul.f32 -1.442695, %v295_v32 }
 0x161   : > { %v288_v35 = vpop.xlane.xlu0 %287 }
 0x162   : > { %1146 = vpow2.f32 %v960_v34  ;;  %v296_v16 = vadd.f32 %v292_v33, %v288_v35 }
 0x164   : > { %v961_v36 = vmul.f32 -1.442695, %v296_v16 }
 0x166   : > { %1148 = vpow2.f32 %v961_v36 }
 0x168   : > { %v1143_v18 = vpop.eup %1142 }
 0x169   : > { %v1145_v37 = vpop.eup %1144  ;;  %v310_v38 = vadd.f32 1.0, %v1143_v18 }
 0x16a   : > { %v309_v39 = vadd.f32 1.0, %v1145_v37 }
 0x16b   : > { %1150 = vrcp.f32 %v310_v38 }
 0x16c   : > { %v1147_v17 = vpop.eup %1146  ;;  %1152 = vrcp.f32 %v309_v39 }
 0x16d   : > { %v311_v40 = vadd.f32 1.0, %v1147_v17 }
 0x16f   : > { %1154 = vrcp.f32 %v311_v40 }
 0x170   : > { %v1149_v41 = vpop.eup %1148 }
 0x171   : > { %v312_v42 = vadd.f32 1.0, %v1149_v41 }
 0x173   : > { %1156 = vrcp.f32 %v312_v42 }
 0x175   : > { %v1151_v19 = vpop.eup %1150 }
 0x176   : > { %v1153_v43 = vpop.eup %1152  ;;  %328 = vperm.xlu1 %1045, %v1151_v19  }
 0x177   : > { %323 = vperm.xlu0 %1044, %v1153_v43  }
 0x179   : > { %v1155_v48 = vpop.eup %1154 }
 0x17a   : > { %333 = vperm.xlu1 %1045, %v1155_v48  }
 0x17d   : > { %v1157_v53 = vpop.eup %1156 }
 0x17e   : > { %338 = vperm.xlu1 %1045, %v1157_v53  }
 0x1f5   : > { %v329_v23 = vpop.permute.xlu1 %328 }
 0x1f6   : > { %v324_v24 = vpop.permute.xlu0 %323  ;;  %v1491_v25 = vmul.f32 %v329_v23, %v1222_v5  ;;  %v1494_v26 = vmul.f32 %v329_v23, %v1224_v6 }
 0x1f7   : > { %v1497_v27 = vmul.f32 %v324_v24, %v1216_v2  ;;  %v1500_v28 = vmul.f32 %v324_v24, %v1220_v4 }
 0x1f9   : > { %v334_v29 = vpop.permute.xlu1 %333  ;;  %v367_v5 = vadd.f32 %v1491_v25, %v1497_v27  ;;  %v376_v6 = vadd.f32 %v1494_v26, %v1500_v28 }
 0x1fa   : > { %v1503_v30 = vmul.f32 %v334_v29, %v1212_v0  ;;  %v1506_v31 = vmul.f32 %v334_v29, %v1214_v1 }
 0x1fc   : > { %v368_v2 = vadd.f32 %v367_v5, %v1503_v30  ;;  %v377_v33 = vadd.f32 %v376_v6, %v1506_v31  ;;  %v349_v1 = vmax.f32 %v1497_v27, %v1503_v30  ;;  %v358_v34 = vmax.f32 %v1500_v28, %v1506_v31 }
 0x1fd   : > { %v339_v32 = vpop.permute.xlu1 %338 }
 0x1fe   : > { %v1515_v4 = vmul.f32 %v339_v32, %v1228_v8  ;;  %v1518_v0 = vmul.f32 %v339_v32, %v1230_v9 }
 0x200   : > { %v350_v35 = vmax.f32 %v1491_v25, %v1515_v4  ;;  %v359_v16 = vmax.f32 %v1494_v26, %v1518_v0  ;;  %v369_v36 = vadd.f32 %v368_v2, %v1515_v4  ;;  %v378_v8 = vadd.f32 %v377_v33, %v1518_v0 }
 0x202   : > { %v351_v18 = vmax.f32 %v349_v1, %v350_v35  ;;  %v370_v37 = vrot.slane %v369_v36, 4  ;;  %v360_v9 = vmax.f32 %v358_v34, %v359_v16  ;;  %v379_v38 = vrot.slane %v378_v8, 4 }
 0x204   : > { %v352_v39 = vrot.slane %v351_v18, 4  ;;  %v371_v17 = vadd.f32 %v370_v37, %v369_v36  ;;  %v361_v40 = vrot.slane %v360_v9, 4  ;;  %v380_v41 = vadd.f32 %v379_v38, %v378_v8 }
 0x206   : > { %v362_v42 = vmax.f32 %v360_v9, %v361_v40  ;;  %v381_v19 = vrot.slane %v380_v41, 2  ;;  %v353_v43 = vmax.f32 %v351_v18, %v352_v39  ;;  %v372_v44 = vrot.slane %v371_v17, 2 }
 0x208   : > { %v363_v45 = vrot.slane %v362_v42, 2  ;;  %v382_v46 = vadd.f32 %v381_v19, %v380_v41  ;;  %v354_v47 = vrot.slane %v353_v43, 2  ;;  %v373_v48 = vadd.f32 %v372_v44, %v371_v17 }
 0x20a   : > { %v364_v49 = vmax.f32 %v362_v42, %v363_v45  ;;  %v383_v50 = vrot.slane %v382_v46, 1  ;;  %v355_v51 = vmax.f32 %v353_v43, %v354_v47  ;;  %v374_v52 = vrot.slane %v373_v48, 1 }
 0x20c   : > { %v365_v53 = vrot.slane %v364_v49, 1  ;;  %v384_v54 = vadd.f32 %v383_v50, %v382_v46  ;;  %v356_v55 = vrot.slane %v355_v51, 1  ;;  %v375_v56 = vadd.f32 %v374_v52, %v373_v48 }
 0x20e   : > { %v366_v57 = vmax.f32 %v364_v49, %v365_v53  ;;  %v387_v58 = vmul.f32 0.03125, %v384_v54  ;;  %v357_v59 = vmax.f32 %v355_v51, %v356_v55  ;;  %v386_v60 = vmul.f32 0.03125, %v375_v56 }
 0x210   : > { %v389_v61 = vpack.c.bf16 %v366_v57, %v366_v57  ;;  %v391_v62 = vpack.c.bf16 %v387_v58, %v387_v58  ;;  %v388_v63 = vpack.c.bf16 %v357_v59, %v357_v59  ;;  %v390_v3 = vpack.c.bf16 %v386_v60, %v386_v60 }
 0x212   : > { %808 = vmatprep.mubr.bf16.mxu1 %v389_v61  ;;  %849 = vmatprep.mubr.bf16.mxu0 %v391_v62 }
 0x213   : > { %809 = vmatmul.mubr.bf16.vlgmr.msra.gmra.mrb[0].mxu1 %v388_v63  ;;  %850 = vmatmul.mubr.bf16.vlgmr.msra.gmra.mrb[0].mxu0 %v390_v3 }
 0x2e6   : > { %v810_v7 = vpop.f32.mrb[0].mxu1  ;;  %v851_v10 = vpop.f32.mrb[0].mxu0 }
 0x2e7   : > { %v852_v11 = vadd.f32 %v851_v10, %v810_v7  ;;  %v812_v12 = vpop.f32.mrb[1].mxu1  ;;  %v853_v13 = vpop.f32.mrb[1].mxu0 }
 0x2e8   : > { %v854_v14 = vadd.f32 %v853_v13, %v812_v12  ;;  %v814_v15 = vpop.f32.mrb[2].mxu1  ;;  %v855_v20 = vpop.f32.mrb[2].mxu0 }
 0x2e9   : > { %v1026_v22 = vmul.f32 -1.442695, %v852_v11  ;;  %v815_v23 = vpop.f32.mrb[3].mxu1  ;;  %v856_v24 = vpop.f32.mrb[3].mxu0 }
 0x2ea   : > { %v1027_v29 = vmul.f32 -1.442695, %v854_v14 }
 0x2eb   : > { %1158 = vpow2.f32 %v1026_v22 }
 0x2ec   : > { %1160 = vpow2.f32 %v1027_v29 }
 0x2f5   : > { %v1159_v5 = vpop.eup %1158 }
 0x2f6   : > { %v1161_v6 = vpop.eup %1160  ;;  %v864_v32 = vadd.f32 1.0, %v1159_v5 }
 0x2f7   : > { %v865_v2 = vadd.f32 1.0, %v1161_v6 }
 0x2f8   : > { %1162 = vrcp.f32 %v864_v32 }
 0x2f9   : > { %1164 = vrcp.f32 %v865_v2 }
 0x302   : > { %v1163_v33 = vpop.eup %1162 }
 0x303   : > { %v1165_v1 = vpop.eup %1164  ;;  %v873_v34 = vrot.slane %v1163_v33, %v1287_v21 }
 0x304   : > { %v877_v35 = vrot.slane %v1165_v1, %v1287_v21 }
 0x305   : > { %v878_v16 = vmul.f32 %v873_v34, %v1497_v27  ;;  %v880_v36 = vmul.f32 %v873_v34, %v1491_v25  ;;  %v882_v8 = vmul.f32 %v873_v34, %v1503_v30  ;;  %v884_v18 = vmul.f32 %v873_v34, %v1515_v4 }
 0x306   : > { %v879_v37 = vmul.f32 %v877_v35, %v1500_v28  ;;  %v881_v9 = vmul.f32 %v877_v35, %v1494_v26  ;;  %v883_v38 = vmul.f32 %v877_v35, %v1506_v31  ;;  %v885_v39 = vmul.f32 %v877_v35, %v1518_v0 }
 0x307   : > { %886 = vst [vmem:[%s170_s15] sm:$0xff] %v878_v16  ;;  %888 = vst [vmem:[%s170_s15 + $0x10] sm:$0xff] %v880_v36 }
 0x308   : > { %890 = vst [vmem:[%s170_s15 + $0x20] sm:$0xff] %v882_v8  ;;  %892 = vst [vmem:[%s170_s15 + $0x30] sm:$0xff] %v884_v18 }
 0x309   : > { %887 = vst [vmem:[%s170_s15 + $0x8] sm:$0xff] %v879_v37  ;;  %889 = vst [vmem:[%s170_s15 + $0x18] sm:$0xff] %v881_v9 }
 0x30a   : > { %891 = vst [vmem:[%s170_s15 + $0x28] sm:$0xff] %v883_v38  ;;  %893 = vst [vmem:[%s170_s15 + $0x38] sm:$0xff] %v885_v39 }
 0x30b PF: > { %s13_s12 = sadd.s32 1, %s1172_s12  }
 0x30c   : > { %p10_p4 = scmp.ge.s32.totalorder %s13_s12, 4  }
 0x30e   :  { %12 = sbr.rel (!%p10_p4) target bundleno = 1 (0x1), region = 62 }

</bundles_post_ra>
